<compile_context>
chip_gen: v5e
topology: v5e:2x2
jax: 0.10.0
libtpu: 0.0.40
codegen_flags: <defaults>
</compile_context>

<pallas_src>
import functools
import math

import jax
import jax.numpy as jnp
from jax.experimental import pallas as pl
from jax.experimental.pallas import tpu as pltpu


# ----------------------------- kernels ------------------------------------- #


def _softmax_f32(s):
    # Numerically stable softmax along the last axis, in float32.
    m = jnp.max(s, axis=-1, keepdims=True)
    e = jnp.exp(s - m)
    denom = jnp.sum(e, axis=-1, keepdims=True)
    # One exact divide per row, then a cheap row-broadcast multiply (instead of a
    # full-precision divide per element).  Stays within the 1e-4 parity tolerance.
    return e * (1.0 / denom)


def _sdpa_kernel(q_ref, k_ref, v_ref, out_ref, score_ref, *, scale):
    # Blocks: q (G,TQ,D), k/v (G,S,D), out (G,TQ,D), score (G,TQ,S).
    q = q_ref[...] * scale            # scale q once: G*TQ*D muls, not G*TQ*S
    k = k_ref[...]
    v = v_ref[...]
    # Q @ K^T as a last-axis contraction in the input dtype, f32 MXU accumulation.
    s = jnp.einsum("gqd,gkd->gqk", q, k, preferred_element_type=jnp.float32)
    p = _softmax_f32(s)
    out = jnp.einsum("gqk,gkd->gqd", p.astype(v.dtype), v,
                     preferred_element_type=jnp.float32)
    out_ref[...] = out.astype(out_ref.dtype)
    score_ref[...] = p.astype(score_ref.dtype)


def _sdpa_kernel_masked(q_ref, k_ref, v_ref, m_ref, out_ref, score_ref, *, scale):
    # Mask block: (Gm, TQ, S) int8, Gm in {1, G}; broadcasts over grouped heads.
    q = q_ref[...] * scale
    k = k_ref[...]
    v = v_ref[...]
    keep = m_ref[...]
    s = jnp.einsum("gqd,gkd->gqk", q, k, preferred_element_type=jnp.float32)
    s = jnp.where(keep == 0, jnp.float32(-10000.0), s)
    p = _softmax_f32(s)
    out = jnp.einsum("gqk,gkd->gqd", p.astype(v.dtype), v,
                     preferred_element_type=jnp.float32)
    out_ref[...] = out.astype(out_ref.dtype)
    score_ref[...] = p.astype(score_ref.dtype)


def _sdpa_kernel_masked_resident(q_ref, k_ref, v_ref, m_ref, out_ref, score_ref,
                                 *, scale, q_tile):
    # m_ref holds the full shared (1, Sq_pad, S) int32 mask: constant index_map means it
    # is DMA'd once and stays VMEM-resident; slice the current q-tile rows here.
    q = q_ref[...] * scale
    k = k_ref[...]
    v = v_ref[...]
    s = jnp.einsum("gqd,gkd->gqk", q, k, preferred_element_type=jnp.float32)
    row0 = pl.multiple_of(pl.program_id(1) * q_tile, q_tile)
    keep = m_ref[0, pl.ds(row0, q_tile), :]          # (TQ, S), broadcasts over G
    s = jnp.where(keep == 0, jnp.float32(-10000.0), s)
    p = _softmax_f32(s)
    out = jnp.einsum("gqk,gkd->gqd", p.astype(v.dtype), v,
                     preferred_element_type=jnp.float32)
    out_ref[...] = out.astype(out_ref.dtype)
    score_ref[...] = p.astype(score_ref.dtype)


# ----------------------------- tiling heuristics ---------------------------- #


def _vmem_capacity_bytes():
    """Physical VMEM per TensorCore; conservative (v7x-sized) fallback."""
    try:
        info = pltpu.get_tpu_info()
        cap = getattr(info, "vmem_capacity_bytes", None)
        if cap:
            return int(cap)
    except Exception:
        pass
    return 64 << 20


def _pick_group(BH, S, D, itemsize):
    """(batch*head) pairs processed per grid step.  Group when per-head tiles are tiny so
    per-step overhead is amortized and the 128-lane vregs / MXU columns get filled."""
    if S >= 128 and D >= 128:
        return 1
    g = 1
    for cand in range(1, BH + 1):
        if BH % cand == 0 and cand * S * D * itemsize <= (1 << 20):  # grouped K or V <= 1 MiB
            g = cand
    return g


def _min_q_tile(itemsize):
    # Sublane packing minimum: 8 rows (f32), 16 (bf16), 32 (int8/fp8).
    return 8 * max(1, 4 // max(1, itemsize))


def _footprint_bytes(tq, S, D, G, itemsize, mask_mode):
    """True per-step VMEM need: double-buffered I/O blocks + f32 softmax temporaries."""
    sq_pad = -(-S // tq) * tq
    io = (2 * G * tq * D * itemsize          # q + out blocks
          + 2 * G * S * D * itemsize         # k + v blocks
          + G * tq * S * itemsize)           # score block
    if mask_mode == "per_head":
        io += G * tq * S                     # int8 per-(b,h) mask block
    elif mask_mode == "shared_tiled":
        io += tq * S                         # int8 shared mask block
    temps = 3 * G * tq * S * 4 + G * tq * D * 4   # s / exp / p (f32) + f32 out
    resident = 2 * sq_pad * S * 4 if mask_mode == "shared_resident" else 0  # int32, 2 bufs
    return 2 * io + temps + resident


def _pick_q_tile(S, D, G, itemsize, mask_mode, budget):
    """Largest query tile whose double-buffered blocks + f32 temps fit the per-generation
    VMEM budget.  Non-dividing S is handled by padding the query axis (never a full-S tile)."""
    min_tq = _min_q_tile(itemsize)
    if S <= min_tq:
        return S                              # single full-S tile; Mosaic pads layout
    cands = [t for t in (1024, 512, 256, 128, 64, 32, 16, 8)
             if min_tq <= t <= S]
    if not cands:
        cands = [min_tq]
    for tq in cands:
        if _footprint_bytes(tq, S, D, G, itemsize, mask_mode) <= budget:
            return tq
    return cands[-1]


# ----------------------------- wrapper -------------------------------------- #


def scale_dot_product_attention(q, k, v, mask=None, e=1e-12, compute_dtype=None):
    """q, k, v: (B, H, S, D). mask: broadcastable to (B, H, S, S) or None.

    Returns (out, score) with out: (B, H, S, D), score: (B, H, S, S), both in q.dtype.
    `compute_dtype` (e.g. jnp.bfloat16) is an opt-in throughput/precision knob.
    """
    del e  # unused by the reference module as well
    B, H, S, D = q.shape
    out_dtype = q.dtype
    if compute_dtype is not None:
        q = q.astype(compute_dtype)
        k = k.astype(compute_dtype)
        v = v.astype(compute_dtype)
    dtype = q.dtype
    itemsize = jnp.dtype(dtype).itemsize
    BH = B * H
    scale = 1.0 / math.sqrt(D)

    # --- mask preprocessing: int8 keep-mask, either shared (1,S,S) or folded (BH,S,S) ---
    mask_mode = "none"
    keep = None
    if mask is not None:
        m = jnp.asarray(mask)
        if m.ndim > 4:
            raise ValueError("mask rank must be <= 4")
        m = m.reshape((1,) * (4 - m.ndim) + m.shape)
        km = (m != 0).astype(jnp.int8)          # exact `mask == 0` semantics, 1 byte/elem
        if km.shape[0] == 1 and km.shape[1] == 1:
            keep = jnp.broadcast_to(km, (1, 1, S, S)).reshape(1, S, S)
            mask_mode = "shared"
        else:
            keep = jnp.broadcast_to(km, (B, H, S, S)).reshape(BH, S, S)
            mask_mode = "per_head"

    # --- generation-aware VMEM budgeting (review items 1 & 2) ---
    cap = _vmem_capacity_bytes()
    if cap <= (64 << 20):                         # v7x-class: 64 MiB per TensorCore
        limit_cap = 56 << 20
    else:                                         # v5e / v6e: 128 MiB
        limit_cap = min(cap - (28 << 20), 100 << 20)
    limit_cap = max(limit_cap, 32 << 20)
    block_budget = limit_cap - (6 << 20)          # headroom for compiler-internal scratch

    G = _pick_group(BH, S, D, itemsize)
    mode_for_tile = "shared_tiled" if mask_mode == "shared" else mask_mode
    TQ = _pick_q_tile(S, D, G, itemsize, mode_for_tile, block_budget)
    n_q = -(-S // TQ)
    Sq_pad = n_q * TQ

    if mask_mode == "shared":
        # Hoist the shared mask into a VMEM-resident full block only when the q axis is
        # actually tiled (for n_q == 1 the tiled spec already fetches it exactly once).
        resident_fp = _footprint_bytes(TQ, S, D, G, itemsize, "shared_resident")
        if n_q > 1 and 2 * Sq_pad * S * 4 <= (16 << 20) and resident_fp <= block_budget:
            mask_mode = "shared_resident"
            keep = keep.astype(jnp.int32)         # aligned in-kernel row slicing
        else:
            mask_mode = "shared_tiled"

    # --- fold batch*heads; pad the query axis so TQ tiles it exactly ---
    qf = q.reshape(BH, S, D)
    kf = k.reshape(BH, S, D)
    vf = v.reshape(BH, S, D)
    if Sq_pad != S:
        qf = jnp.pad(qf, ((0, 0), (0, Sq_pad - S), (0, 0)))
        if keep is not None:
            keep = jnp.pad(keep, ((0, 0), (0, Sq_pad - S), (0, 0)), constant_values=1)

    in_specs = [
        pl.BlockSpec((G, TQ, D), lambda g, qi: (g, qi, 0)),   # q
        pl.BlockSpec((G, S, D), lambda g, qi: (g, 0, 0)),     # k (reused across q tiles)
        pl.BlockSpec((G, S, D), lambda g, qi: (g, 0, 0)),     # v (reused across q tiles)
    ]
    operands = [qf, kf, vf]
    if mask_mode == "per_head":
        in_specs.append(pl.BlockSpec((G, TQ, S), lambda g, qi: (g, qi, 0)))
        operands.append(keep)
        kernel = functools.partial(_sdpa_kernel_masked, scale=scale)
    elif mask_mode == "shared_tiled":
        in_specs.append(pl.BlockSpec((1, TQ, S), lambda g, qi: (0, qi, 0)))
        operands.append(keep)
        kernel = functools.partial(_sdpa_kernel_masked, scale=scale)
    elif mask_mode == "shared_resident":
        # Constant index_map -> the whole (Sq_pad, S) mask is DMA'd once, stays resident.
        in_specs.append(pl.BlockSpec((1, Sq_pad, S), lambda g, qi: (0, 0, 0)))
        operands.append(keep)
        kernel = functools.partial(_sdpa_kernel_masked_resident, scale=scale, q_tile=TQ)
    else:
        kernel = functools.partial(_sdpa_kernel, scale=scale)

    grid = (BH // G, n_q)   # q-tile axis innermost -> K/V blocks reused across it

    out_f, score_f = pl.pallas_call(
        kernel,
        out_shape=(
            jax.ShapeDtypeStruct((BH, Sq_pad, D), dtype),
            jax.ShapeDtypeStruct((BH, Sq_pad, S), dtype),
        ),
        grid_spec=pltpu.PrefetchScalarGridSpec(
            num_scalar_prefetch=0,
            grid=grid,
            in_specs=in_specs,
            out_specs=(
                pl.BlockSpec((G, TQ, D), lambda g, qi: (g, qi, 0)),
                pl.BlockSpec((G, TQ, S), lambda g, qi: (g, qi, 0)),
            ),
        ),
        compiler_params=pltpu.CompilerParams(
            # Keep the q-tile axis "arbitrary" so v7x's two TensorCores shard over the
            # folded head axis and never re-fetch the same K/V block.
            dimension_semantics=("parallel", "arbitrary"),
            vmem_limit_bytes=int(limit_cap),
        ),
    )(*operands)

    out = out_f.reshape(B, H, Sq_pad, D)
    score = score_f.reshape(B, H, Sq_pad, S)
    if Sq_pad != S:
        out = out[:, :, :S, :]
        score = score[:, :, :S, :]
    if out.dtype != out_dtype:
        out = out.astype(out_dtype)
        score = score.astype(out_dtype)
    return out, score


# ----------------------------- reference & test ----------------------------- #


def _reference(q, k, v, mask=None):
    d = k.shape[-1]
    score = jnp.einsum("bhqd,bhkd->bhqk", q, k) / math.sqrt(d)
    if mask is not None:
        score = jnp.where(mask == 0, -10000.0, score)
    score = jax.nn.softmax(score, axis=-1)
    out = jnp.einsum("bhqk,bhkd->bhqd", score, v)
    return out, score


if __name__ == "__main__":
    key = jax.random.PRNGKey(0)
    kq, kk, kv = jax.random.split(key, 3)

    B, H, S, D = 2, 4, 8, 32  # (batch, heads, seq, d_tensor)
    q = jax.random.normal(kq, (B, H, S, D), dtype=jnp.float32)
    k = jax.random.normal(kk, (B, H, S, D), dtype=jnp.float32)
    v = jax.random.normal(kv, (B, H, S, D), dtype=jnp.float32)

    # mask=None path (no mask input, no jnp.where)
    out, score = scale_dot_product_attention(q, k, v, mask=None)
    jax.block_until_ready((out, score))
    ref_out, ref_score = _reference(q, k, v, mask=None)
    assert jnp.allclose(out, ref_out, atol=1e-4, rtol=1e-4)
    assert jnp.allclose(score, ref_score, atol=1e-4, rtol=1e-4)

    # masked path: causal mask shared across batch & heads (hoisted shared mask)
    causal = jnp.tril(jnp.ones((S, S), dtype=jnp.int32))[None, None]
    out_m, score_m = scale_dot_product_attention(q, k, v, mask=causal)
    jax.block_until_ready((out_m, score_m))
    ref_out_m, ref_score_m = _reference(q, k, v, mask=causal)
    assert jnp.allclose(out_m, ref_out_m, atol=1e-4, rtol=1e-4)
    assert jnp.allclose(score_m, ref_score_m, atol=1e-4, rtol=1e-4)

    print("KERNEL_OK")
</pallas_src>

<mosaic_0001>
module attributes {stable_mosaic.version = 11 : i64} {
  func.func @_sdpa_kernel(%arg0: i32, %arg1: i32, %arg2: memref<8x8x32xf32, #tpu.memory_space<vmem>>, %arg3: memref<8x8x32xf32, #tpu.memory_space<vmem>>, %arg4: memref<8x8x32xf32, #tpu.memory_space<vmem>>, %arg5: memref<8x8x32xf32, #tpu.memory_space<vmem>>, %arg6: memref<8x8x8xf32, #tpu.memory_space<vmem>>) attributes {dimension_semantics = [#tpu.dimension_semantics<parallel>, #tpu.dimension_semantics<arbitrary>], iteration_bounds = array<i64: 1, 1>, scalar_prefetch = 0 : i64, scratch_operands = 0 : i64, tpu.core_type = #tpu.core_type<tc>, window_params = [{transform_indices = @transform_0, window_bounds = array<i64: 8, 8, 32>}, {transform_indices = @transform_1, window_bounds = array<i64: 8, 8, 32>}, {transform_indices = @transform_2, window_bounds = array<i64: 8, 8, 32>}, {transform_indices = @transform_3, window_bounds = array<i64: 8, 8, 32>}, {transform_indices = @transform_4, window_bounds = array<i64: 8, 8, 8>}]} {
    %c0 = arith.constant 0 : index
    %c0_0 = arith.constant 0 : index
    %c0_1 = arith.constant 0 : index
    %0 = vector.load %arg2[%c0, %c0_0, %c0_1] : memref<8x8x32xf32, #tpu.memory_space<vmem>>, vector<8x8x32xf32>
    %cst = arith.constant 0.176776692 : f32
    %1 = vector.broadcast %cst : f32 to vector<8x8x32xf32>
    %2 = arith.mulf %0, %1 : vector<8x8x32xf32>
    %c0_2 = arith.constant 0 : index
    %c0_3 = arith.constant 0 : index
    %c0_4 = arith.constant 0 : index
    %3 = vector.load %arg3[%c0_2, %c0_3, %c0_4] : memref<8x8x32xf32, #tpu.memory_space<vmem>>, vector<8x8x32xf32>
    %c0_5 = arith.constant 0 : index
    %c0_6 = arith.constant 0 : index
    %c0_7 = arith.constant 0 : index
    %4 = vector.load %arg4[%c0_5, %c0_6, %c0_7] : memref<8x8x32xf32, #tpu.memory_space<vmem>>, vector<8x8x32xf32>
    "tpu.trace_start"() <{level = 10 : i32, message = "gqd,gkd->gqk"}> : () -> ()
    %cst_8 = arith.constant dense<0.000000e+00> : vector<8x8x8xf32>
    %5 = tpu.matmul %2, %3, %cst_8 {dimension_numbers = #tpu.dot_dimension_numbers<[2], [2], [1], [1], [0, 0, 0, 1, 1, 1], [0], [0]>} : vector<8x8x32xf32>, vector<8x8x32xf32>, vector<8x8x8xf32> -> vector<8x8x8xf32>
    "tpu.trace_stop"() : () -> ()
    %cst_9 = arith.constant dense<0xFF800000> : vector<8x8xf32>
    %6 = vector.multi_reduction <maximumf>, %5, %cst_9 [2] : vector<8x8x8xf32> to vector<8x8xf32>
    %7 = vector.shape_cast %6 : vector<8x8xf32> to vector<8x8x1xf32>
    %8 = vector.broadcast %7 : vector<8x8x1xf32> to vector<8x8x8xf32>
    %9 = arith.subf %5, %8 : vector<8x8x8xf32>
    %10 = math.exp %9 : vector<8x8x8xf32>
    %cst_10 = arith.constant dense<0.000000e+00> : vector<8x8xf32>
    %11 = vector.multi_reduction <add>, %10, %cst_10 [2] : vector<8x8x8xf32> to vector<8x8xf32>
    %12 = vector.shape_cast %11 : vector<8x8xf32> to vector<8x8x1xf32>
    %cst_11 = arith.constant 1.000000e+00 : f32
    %13 = vector.broadcast %cst_11 : f32 to vector<8x8x1xf32>
    %14 = arith.divf %13, %12 : vector<8x8x1xf32>
    %15 = vector.broadcast %14 : vector<8x8x1xf32> to vector<8x8x8xf32>
    %16 = arith.mulf %10, %15 : vector<8x8x8xf32>
    "tpu.trace_start"() <{level = 10 : i32, message = "gqk,gkd->gqd"}> : () -> ()
    %cst_12 = arith.constant dense<0.000000e+00> : vector<8x8x32xf32>
    %17 = tpu.matmul %16, %4, %cst_12 {dimension_numbers = #tpu.dot_dimension_numbers<[2], [1], [1], [2], [0, 0, 0, 1, 1, 2], [0], [0]>} : vector<8x8x8xf32>, vector<8x8x32xf32>, vector<8x8x32xf32> -> vector<8x8x32xf32>
    "tpu.trace_stop"() : () -> ()
    %c0_13 = arith.constant 0 : index
    %c0_14 = arith.constant 0 : index
    %c0_15 = arith.constant 0 : index
    %18 = vector.load %arg5[%c0_13, %c0_14, %c0_15] : memref<8x8x32xf32, #tpu.memory_space<vmem>>, vector<8x8x32xf32>
    tpu.vector_store %arg5[%c0_13, %c0_14, %c0_15], %17 {strides = array<i32>} : memref<8x8x32xf32, #tpu.memory_space<vmem>>, vector<8x8x32xf32>,
    %c0_16 = arith.constant 0 : index
    %c0_17 = arith.constant 0 : index
    %c0_18 = arith.constant 0 : index
    %19 = vector.load %arg6[%c0_16, %c0_17, %c0_18] : memref<8x8x8xf32, #tpu.memory_space<vmem>>, vector<8x8x8xf32>
    tpu.vector_store %arg6[%c0_16, %c0_17, %c0_18], %16 {strides = array<i32>} : memref<8x8x8xf32, #tpu.memory_space<vmem>>, vector<8x8x8xf32>,
    return
  }
  func.func @transform_0(%arg0: i32, %arg1: i32) -> (i32, i32, i32) {
    %c0_i32 = arith.constant 0 : i32
    %c0_i32_0 = arith.constant 0 : i32
    return %arg0, %arg1, %c0_i32 : i32, i32, i32
  }
  func.func @transform_1(%arg0: i32, %arg1: i32) -> (i32, i32, i32) {
    %c0_i32 = arith.constant 0 : i32
    %c0_i32_0 = arith.constant 0 : i32
    %c0_i32_1 = arith.constant 0 : i32
    return %arg0, %c0_i32, %c0_i32_0 : i32, i32, i32
  }
  func.func @transform_2(%arg0: i32, %arg1: i32) -> (i32, i32, i32) {
    %c0_i32 = arith.constant 0 : i32
    %c0_i32_0 = arith.constant 0 : i32
    %c0_i32_1 = arith.constant 0 : i32
    return %arg0, %c0_i32, %c0_i32_0 : i32, i32, i32
  }
  func.func @transform_3(%arg0: i32, %arg1: i32) -> (i32, i32, i32) {
    %c0_i32 = arith.constant 0 : i32
    %c0_i32_0 = arith.constant 0 : i32
    return %arg0, %arg1, %c0_i32 : i32, i32, i32
  }
  func.func @transform_4(%arg0: i32, %arg1: i32) -> (i32, i32, i32) {
    %c0_i32 = arith.constant 0 : i32
    %c0_i32_0 = arith.constant 0 : i32
    return %arg0, %arg1, %c0_i32 : i32, i32, i32
  }
}

</mosaic_0001>

<bundles_post_ra>
// kernel: tpu_custom_call.1
= control target key start
LH: loop header
LB: loop body
LE: loop exit
PB: predicated region body
PF: predicated region fallthrough
CT: control target
= control target key end

     0   :  { %10 = vsyncpa [#allocation3], 0  ;;  %s1145_s0 = inlined_call_operand.hbm [shape: f32[8,8,32], index: 0, kind: input, shape index: {}]   ;;  %s1146_s1 = inlined_call_operand.hbm [shape: f32[8,8,32], index: 1, kind: input, shape index: {}]   ;;  %s1147_s2 = inlined_call_operand.hbm [shape: f32[8,8,32], index: 2, kind: input, shape index: {}]   ;;  %s1148_s3 = inlined_call_operand.hbm [shape: f32[8,8,32], index: 3, kind: output, shape index: {0}]   ;;  %s1149_s4 = inlined_call_operand.hbm [shape: f32[8,8,8], index: 4, kind: output, shape index: {1}]  }
   0x1   :  { %11 = vsyncpa [#allocation6], 0 }
   0x2   :  { %12 = vsyncpa [#allocation4], 0 }
   0x3   :  { %13 = vsyncpa [#allocation10], 0  ;;  %s31_s17 = sshll.u32 %s1146_s1, 4  ;;  %s936_s18 = smov [#allocation5]   ;;  %s32_s17 = int_to_ptr.hbm [resolvable:$true] %s31_s17 }
   0x4   :  { %s33_s19 = sshll.u32 %s936_s18, 4  ;;  %s18_s22 = sshll.u32 %s1145_s0, 4  ;;  %s34_s19 = int_to_ptr.vmem [resolvable:$true] %s33_s19  ;;  %s19_s22 = int_to_ptr.hbm [resolvable:$true] %s18_s22 }
   0x5   :  { %s937_s23 = smov 128   ;;  %s938_s24 = smov 8  }
   0x6   :  { %39 = dma.hbm_to_vmem [thread:$0]  %s32_s17, 1024, %s34_s19, [#allocation6], %s937_s23, %s937_s23, %s938_s24  }
   0x7   :  { %s939_s25 = smov [#allocation2]   ;;  %s44_s1 = sshll.u32 %s1147_s2, 4  ;;  %s45_s1 = int_to_ptr.hbm [resolvable:$true] %s44_s1 }
   0x8   :  { %s20_s26 = sshll.u32 %s939_s25, 4  ;;  %s940_s0 = smov [#allocation7]   ;;  %s21_s26 = int_to_ptr.vmem [resolvable:$true] %s20_s26 }
   0x9   :  { %26 = dma.hbm_to_vmem [thread:$0]  %s19_s22, 1024, %s21_s26, [#allocation3], %s937_s23, %s937_s23, %s938_s24  }
   0xa   :  { %s46_s29 = sshll.u32 %s940_s0, 4  ;;  %s47_s29 = int_to_ptr.vmem [resolvable:$true] %s46_s29 }
   0xb   :  { %52 = dma.hbm_to_vmem [thread:$0]  %s45_s1, 1024, %s47_s29, [#allocation6], %s937_s23, %s937_s23, %s938_s24  }
   0xc   :  { %928 = dma.done.wait [#allocation3], 1024  }
   0xd   :  { %929 = vsyncadd [#allocation3], 4294966272 }
   0xe   :  { %930 = dma.done.wait [#allocation6], 2048  }
   0xf   :  { %931 = vsyncadd [#allocation6], 4294965248  ;;  %vm97_vm0 = vcmask 261120   ;;  %v81_v0 = vld [vmem:[#allocation5] sm:$0xff]  ;;  %v83_v1 = vld [vmem:[#allocation5 + $0x10] sm:$0xff]  ;;  %vm306_vm1 = vcmask 64512  }
  0x10   :  { %v65_v2 = vld [vmem:[#allocation2] sm:$0xff]  ;;  %745 = vmatpush.xpose.msk.msra.mxu0 %vm97_vm0, %v81_v0  ;;  %749 = vmatpush.xpose.msk.msra.mxu2 %vm97_vm0, %v83_v1  ;;  %v67_v4 = vld [vmem:[#allocation2 + $0x10] sm:$0xff]  ;;  %v82_v6 = vld [vmem:[#allocation5 + $0x8] sm:$0xff]  ;;  %s941_s2 = smov [#allocation9]   ;;  %s726_s7 = sshll.u32 %s1149_s4, 4  ;;  %s727_s7 = int_to_ptr.hbm [resolvable:$true] %s726_s7 }
  0x11   :  { %v73_v3 = vmul.f32 0.17677669, %v65_v2  ;;  %v87_v5 = vld [vmem:[#allocation5 + $0x30] sm:$0xff]  ;;  %v75_v7 = vmul.f32 0.17677669, %v67_v4  ;;  %747 = vmatpush.xpose.msk.msra.mxu1 %vm97_vm0, %v82_v6  ;;  %v84_v8 = vld [vmem:[#allocation5 + $0x18] sm:$0xff] }
  0x12   :  { %v66_v9 = vld [vmem:[#allocation2 + $0x8] sm:$0xff]  ;;  %v68_v10 = vld [vmem:[#allocation2 + $0x18] sm:$0xff]  ;;  %751 = vmatpush.xpose.msk.msra.mxu3 %vm97_vm0, %v84_v8  ;;  %v71_v15 = vld [vmem:[#allocation2 + $0x30] sm:$0xff]  ;;  %s724_s30 = sshll.u32 %s941_s2, 4  ;;  %s942_s4 = smov [#allocation8]   ;;  %s725_s30 = int_to_ptr.vmem [resolvable:$true] %s724_s30 }
  0x13   :  { %v74_v11 = vmul.f32 0.17677669, %v66_v9  ;;  %v76_v12 = vmul.f32 0.17677669, %v68_v10  ;;  %v88_v13 = vld [vmem:[#allocation5 + $0x38] sm:$0xff]  ;;  %746 = vmatmul.msk.f32.vlgmr.msra.gmra.mxu0 %vm97_vm0, %v73_v3  ;;  %750 = vmatmul.msk.f32.vlgmr.msra.gmra.mxu2 %vm97_vm0, %v75_v7  ;;  %v86_v14 = vld [vmem:[#allocation5 + $0x28] sm:$0xff] }
  0x14   :  { %757 = vmatpush.xpose.msk.msrb.mxu2 %vm97_vm0, %v87_v5  ;;  %v85_v16 = vld [vmem:[#allocation5 + $0x20] sm:$0xff]  ;;  %v70_v18 = vld [vmem:[#allocation2 + $0x28] sm:$0xff]  ;;  %v72_v19 = vld [vmem:[#allocation2 + $0x38] sm:$0xff]  ;;  %v79_v20 = vmul.f32 0.17677669, %v71_v15  ;;  %s711_s8 = sshll.u32 %s942_s4, 4  ;;  %s712_s8 = int_to_ptr.vmem [resolvable:$true] %s711_s8 }
  0x15   :  { %748 = vmatmul.msk.f32.vlgmr.msra.gmra.mxu1 %vm97_vm0, %v74_v11  ;;  %v69_v17 = vld [vmem:[#allocation2 + $0x20] sm:$0xff]  ;;  %752 = vmatmul.msk.f32.vlgmr.msra.gmra.mxu3 %vm97_vm0, %v76_v12  ;;  %v78_v22 = vmul.f32 0.17677669, %v70_v18  ;;  %v80_v23 = vmul.f32 0.17677669, %v72_v19  ;;  %s713_s11 = sshll.u32 %s1148_s3, 4  ;;  %s714_s11 = int_to_ptr.hbm [resolvable:$true] %s713_s11 }
  0x16   :  { %759 = vmatpush.xpose.msk.msrb.mxu3 %vm97_vm0, %v88_v13  ;;  %755 = vmatpush.xpose.msk.msrb.mxu1 %vm97_vm0, %v86_v14  ;;  %v77_v21 = vmul.f32 0.17677669, %v69_v17  ;;  %v91_v17 = vld [vmem:[#allocation7 + $0x10] sm:$0xff] }
  0x17   :  { %753 = vmatpush.xpose.msk.msrb.mxu0 %vm97_vm0, %v85_v16  ;;  %v89_v16 = vld [vmem:[#allocation7] sm:$0xff] }
  0x18   :  { %571 = vmatpush.msra.mxu2 %v91_v17 }
  0x1b   :  { %758 = vmatmul.msk.f32.vlgmr.msrb.gmra.mxu2 %vm97_vm0, %v79_v20  ;;  %754 = vmatmul.msk.f32.vlgmr.msrb.gmra.mxu0 %vm97_vm0, %v77_v21  ;;  %v92_v20 = vld [vmem:[#allocation7 + $0x18] sm:$0xff]  ;;  %v90_v21 = vld [vmem:[#allocation7 + $0x8] sm:$0xff] }
  0x1c   :  { %525 = vmatpush.msra.mxu0 %v89_v16  ;;  %594 = vmatpush.msra.mxu3 %v92_v20 }
  0x1d   :  { %756 = vmatmul.msk.f32.vlgmr.msrb.gmra.mxu1 %vm97_vm0, %v78_v22  ;;  %760 = vmatmul.msk.f32.vlgmr.msrb.gmra.mxu3 %vm97_vm0, %v80_v23 }
  0x1e   :  { %548 = vmatpush.msra.mxu1 %v90_v21 }
  0x90   :  { %v121_v24 = vpop.f32.mrf.mxu0 }
  0x91   :  { %v307_v25 = vsel %vm306_vm1, %v121_v24, -inf }
  0x92   :  { %308 = vmax.xlane.f32.xlu1 %v307_v25  ;;  %v147_v26 = vpop.f32.mrf.mxu1 }
  0x93   :  { %v310_v29 = vsel %vm306_vm1, %v147_v26, -inf }
  0x96   :  { %v173_v27 = vpop.f32.mrf.mxu2 }
  0x97   :  { %v313_v28 = vsel %vm306_vm1, %v173_v27, -inf }
  0x98   :  { %314 = vmax.xlane.f32.xlu0 %v313_v28  ;;  %v199_v30 = vpop.f32.mrf.mxu3  ;;  %v225_v36 = vpop.f32.mrf.mxu0 }
  0x99   :  { %v316_v32 = vsel %vm306_vm1, %v199_v30, -inf  ;;  %v319_v39 = vsel %vm306_vm1, %v225_v36, -inf }
  0x9a   :  { %311 = vmax.xlane.f32.xlu1 %v310_v29  ;;  %v251_v31 = vpop.f32.mrf.mxu1 }
  0x9b   :  { %v322_v35 = vsel %vm306_vm1, %v251_v31, -inf }
  0x9e   :  { %v277_v33 = vpop.f32.mrf.mxu2 }
  0x9f   :  { %v325_v34 = vsel %vm306_vm1, %v277_v33, -inf }
  0xa0   :  { %317 = vmax.xlane.f32.xlu0 %v316_v32  ;;  %326 = vmax.xlane.f32.xlu2 %v325_v34  ;;  %v303_v37 = vpop.f32.mrf.mxu3  ;;  %v96_v34 = vld [vmem:[#allocation7 + $0x38] sm:$0xff] }
  0xa1   :  { %v328_v38 = vsel %vm306_vm1, %v303_v37, -inf  ;;  %686 = vmatpush.msrb.mxu3 %v96_v34 }
  0xa2   :  { %323 = vmax.xlane.f32.xlu1 %v322_v35  ;;  %v93_v35 = vld [vmem:[#allocation7 + $0x20] sm:$0xff] }
  0xa3   :  { %617 = vmatpush.msrb.mxu0 %v93_v35 }
  0xa8   :  { %329 = vmax.xlane.f32.xlu2 %v328_v38  ;;  %320 = vmax.xlane.f32.xlu0 %v319_v39 }
 0x105   :  { %v309_v40 = vpop.xlane.xlu1 %308 }
 0x106   :  { %v331_v41 = vsub.f32 %v121_v24, %v309_v40 }
 0x108   :  { %v339_v42 = vmul.f32 1.442695, %v331_v41 }
 0x10a   :  { %776 = vpow2.f32 %v339_v42  ;;  %v94_v42 = vld [vmem:[#allocation7 + $0x28] sm:$0xff] }
 0x10b   :  { %v315_v43 = vpop.xlane.xlu0 %314  ;;  %640 = vmatpush.msrb.mxu1 %v94_v42 }
 0x10c   :  { %v333_v44 = vsub.f32 %v173_v27, %v315_v43 }
 0x10d   :  { %v312_v45 = vpop.xlane.xlu1 %311 }
 0x10e   :  { %v343_v46 = vmul.f32 1.442695, %v333_v44  ;;  %v332_v47 = vsub.f32 %v147_v26, %v312_v45 }
 0x110   :  { %v1010_v48 = vpop.eup %776  ;;  %778 = vpow2.f32 %v343_v46  ;;  %v341_v50 = vmul.f32 1.442695, %v332_v47 }
 0x111   :  { %v355_v49 = vsel %vm306_vm1, %v1010_v48, 0.0 }
 0x112   :  { %356 = vadd.xlane.f32.xlu1 %v355_v49  ;;  %780 = vpow2.f32 %v341_v50 }
 0x113   :  { %v318_v51 = vpop.xlane.xlu0 %317  ;;  %v327_v52 = vpop.xlane.xlu2 %326 }
 0x114   :  { %v334_v53 = vsub.f32 %v199_v30, %v318_v51  ;;  %v337_v56 = vsub.f32 %v277_v33, %v327_v52  ;;  %v95_v33 = vld [vmem:[#allocation7 + $0x30] sm:$0xff] }
 0x115   :  { %v324_v59 = vpop.xlane.xlu1 %323  ;;  %663 = vmatpush.msrb.mxu2 %v95_v33 }
 0x116   :  { %v1014_v54 = vpop.eup %778  ;;  %v345_v55 = vmul.f32 1.442695, %v334_v53  ;;  %v351_v58 = vmul.f32 1.442695, %v337_v56  ;;  %v336_v2 = vsub.f32 %v251_v31, %v324_v59 }
 0x117   :  { %v361_v57 = vsel %vm306_vm1, %v1014_v54, 0.0 }
 0x118   :  { %782 = vpow2.f32 %v345_v55  ;;  %362 = vadd.xlane.f32.xlu2 %v361_v57  ;;  %v1018_v62 = vpop.eup %780  ;;  %v349_v7 = vmul.f32 1.442695, %v336_v2 }
 0x119   :  { %784 = vpow2.f32 %v351_v58  ;;  %v358_v5 = vsel %vm306_vm1, %v1018_v62, 0.0 }
 0x11b   :  { %v330_v60 = vpop.xlane.xlu2 %329  ;;  %v321_v61 = vpop.xlane.xlu0 %320 }
 0x11c   :  { %v338_v63 = vsub.f32 %v303_v37, %v330_v60  ;;  %v335_v0 = vsub.f32 %v225_v36, %v321_v61 }
 0x11e   :  { %v1020_v1 = vpop.eup %782  ;;  %v353_v3 = vmul.f32 1.442695, %v338_v63  ;;  %v347_v4 = vmul.f32 1.442695, %v335_v0 }
 0x11f   :  { %v364_v6 = vsel %vm306_vm1, %v1020_v1, 0.0  ;;  %v1026_v8 = vpop.eup %784 }
 0x120   :  { %786 = vpow2.f32 %v353_v3  ;;  %359 = vadd.xlane.f32.xlu2 %v358_v5  ;;  %365 = vadd.xlane.f32.xlu0 %v364_v6  ;;  %v373_v12 = vsel %vm306_vm1, %v1026_v8, 0.0 }
 0x121   :  { %788 = vpow2.f32 %v347_v4 }
 0x122   :  { %790 = vpow2.f32 %v349_v7 }
 0x126   :  { %v1028_v9 = vpop.eup %786 }
 0x127   :  { %v1030_v10 = vpop.eup %788  ;;  %v376_v11 = vsel %vm306_vm1, %v1028_v9, 0.0 }
 0x128   :  { %377 = vadd.xlane.f32.xlu1 %v376_v11  ;;  %374 = vadd.xlane.f32.xlu0 %v373_v12  ;;  %v367_v13 = vsel %vm306_vm1, %v1030_v10, 0.0  ;;  %v1038_v14 = vpop.eup %790 }
 0x129   :  { %368 = vadd.xlane.f32.xlu2 %v367_v13  ;;  %v370_v15 = vsel %vm306_vm1, %v1038_v14, 0.0 }
 0x130   :  { %371 = vadd.xlane.f32.xlu0 %v370_v15 }
 0x185   :  { %v357_v18 = vpop.xlane.xlu1 %356 }
 0x186   :  { %792 = vrcp.f32 %v357_v18  ;;  %v390_v25 = vand.u32 2147483648, %v357_v18  ;;  %v388_v27 = vand.u32 2147483647, %v357_v18  ;;  %vm384_vm3 = vweird.f32 %v357_v18 }
 0x188   :  { %v391_v36 = vor.u32 1.1754944e-38, %v390_v25  ;;  %vm389_vm5 = vcmp.eq.f32.partialorder %v388_v27, 8.507059e+37 }
 0x18b   :  { %v363_v19 = vpop.xlane.xlu2 %362 }
 0x18c   :  { %v793_v22 = vpop.eup %792  ;;  %794 = vrcp.f32 %v363_v19  ;;  %v418_v44 = vand.u32 2147483647, %v363_v19  ;;  %v420_v45 = vand.u32 2147483648, %v363_v19  ;;  %vm414_vm7 = vweird.f32 %v363_v19 }
 0x18d   :  { %v380_v23 = vmul.f32 %v793_v22, %v357_v18  ;;  %vm385_vm2 = vweird.f32 %v793_v22 }
 0x18e   :  { %vm386_vm4 = vmor %vm384_vm3, %vm385_vm2  ;;  %vm419_vm9 = vcmp.eq.f32.partialorder %v418_v44, 8.507059e+37  ;;  %v421_v56 = vor.u32 1.1754944e-38, %v420_v45 }
 0x18f   :  { %v381_v24 = vsub.f32 1.0, %v380_v23 }
 0x191   :  { %v382_v26 = vmul.f32 %v793_v22, %v381_v24 }
 0x192   :  { %v795_v28 = vpop.eup %794 }
 0x193   :  { %v383_v29 = vadd.f32 %v793_v22, %v382_v26  ;;  %v410_v30 = vmul.f32 %v795_v28, %v363_v19  ;;  %v360_v31 = vpop.xlane.xlu2 %359  ;;  %v1042_v32 = vpop.xlane.xlu0 %365  ;;  %vm415_vm6 = vweird.f32 %v795_v28 }
 0x194   :  { %796 = vrcp.f32 %v360_v31  ;;  %vm1048_vm8 = vmor %vm414_vm7, %vm415_vm6  ;;  %v403_v58 = vand.u32 2147483647, %v360_v31  ;;  %v405_v59 = vand.u32 2147483648, %v360_v31  ;;  %v433_v61 = vand.u32 2147483647, %v1042_v32 }
 0x195   :  { %v387_v37 = vsel %vm386_vm4, %v793_v22, %v383_v29  ;;  %v411_v38 = vsub.f32 1.0, %v410_v30  ;;  %798 = vrcp.f32 %v1042_v32  ;;  %v435_v2 = vand.u32 2147483648, %v1042_v32 }
 0x196   :  { %v392_v39 = vsel %vm389_vm5, %v391_v36, %v387_v37  ;;  %vm399_vm12 = vweird.f32 %v360_v31  ;;  %vm429_vm13 = vweird.f32 %v1042_v32  ;;  %vm404_vm15 = vcmp.eq.f32.partialorder %v403_v58, 8.507059e+37 }
 0x197   :  { %v412_v40 = vmul.f32 %v795_v28, %v411_v38  ;;  %v499_v41 = vmul.f32 %v1010_v48, %v392_v39  ;;  %v406_v6 = vor.u32 1.1754944e-38, %v405_v59  ;;  %vm434_vm3 = vcmp.eq.f32.partialorder %v433_v61, 8.507059e+37 }
 0x198   :  { %v436_v13 = vor.u32 1.1754944e-38, %v435_v2 }
 0x199   :  { %v413_v43 = vadd.f32 %v795_v28, %v412_v40  ;;  %761 = vmatmul.msk.f32.vlgmr.msra.gmra.mxu0 %vm306_vm1, %v499_v41  ;;  %699 = vst.msk [vmem:[#allocation9] sm:$0xff] %vm306_vm1, %v499_v41 }
 0x19a   :  { %v797_v46 = vpop.eup %796 }
 0x19b   :  { %v799_v47 = vpop.eup %798  ;;  %v395_v50 = vmul.f32 %v797_v46, %v360_v31  ;;  %v1052_v51 = vpop.xlane.xlu1 %377  ;;  %v417_v52 = vsel %vm1048_vm8, %v795_v28, %v413_v43  ;;  %vm400_vm10 = vweird.f32 %v797_v46 }
 0x19c   :  { %v1054_v48 = vpop.xlane.xlu0 %374  ;;  %v425_v53 = vmul.f32 %v799_v47, %v1042_v32  ;;  %800 = vrcp.f32 %v1052_v51  ;;  %v1060_v55 = vpop.xlane.xlu2 %368  ;;  %v422_v63 = vsel %vm419_vm9, %v421_v56, %v417_v52  ;;  %vm430_vm11 = vweird.f32 %v799_v47  ;;  %vm401_vm14 = vmor %vm399_vm12, %vm400_vm10 }
 0x19d   :  { %v396_v57 = vsub.f32 1.0, %v395_v50  ;;  %802 = vrcp.f32 %v1060_v55  ;;  %v501_v11 = vmul.f32 %v1014_v54, %v422_v63  ;;  %vm431_vm2 = vmor %vm429_vm13, %vm430_vm11  ;;  %v493_v20 = vand.u32 2147483647, %v1052_v51 }
 0x19e   :  { %v426_v60 = vsub.f32 1.0, %v425_v53  ;;  %804 = vrcp.f32 %v1054_v48  ;;  %vm489_vm4 = vweird.f32 %v1052_v51  ;;  %v495_v24 = vand.u32 2147483648, %v1052_v51 }
 0x19f   :  { %v397_v0 = vmul.f32 %v797_v46, %v396_v57  ;;  %763 = vmatmul.msk.f32.vlgmr.msra.gmra.mxu2 %vm306_vm1, %v501_v11  ;;  %701 = vst.msk [vmem:[#allocation9 + $0x10] sm:$0xff] %vm306_vm1, %v501_v11  ;;  %vm444_vm5 = vweird.f32 %v1060_v55  ;;  %v448_v25 = vand.u32 2147483647, %v1060_v55  ;;  %vm1082_vm7 = vcmp.eq.f32.partialorder %v493_v20, 8.507059e+37 }
 0x1a0   :  { %v427_v3 = vmul.f32 %v799_v47, %v426_v60  ;;  %v450_v31 = vand.u32 2147483648, %v1060_v55  ;;  %v478_v32 = vand.u32 2147483647, %v1054_v48  ;;  %v496_v37 = vor.u32 1.1754944e-38, %v495_v24 }
 0x1a1   :  { %v398_v4 = vadd.f32 %v797_v46, %v397_v0  ;;  %vm1093_vm10 = vcmp.eq.f32.partialorder %v448_v25, 8.507059e+37  ;;  %v480_v39 = vand.u32 2147483648, %v1054_v48  ;;  %vm474_vm13 = vweird.f32 %v1054_v48 }
 0x1a2   :  { %v801_v5 = vpop.eup %800  ;;  %v428_v7 = vadd.f32 %v799_v47, %v427_v3  ;;  %v451_v44 = vor.u32 1.1754944e-38, %v450_v31 }
 0x1a3   :  { %v402_v12 = vsel %vm401_vm14, %v797_v46, %v398_v4  ;;  %v485_v15 = vmul.f32 %v801_v5, %v1052_v51  ;;  %v803_v17 = vpop.eup %802  ;;  %vm490_vm6 = vweird.f32 %v801_v5  ;;  %vm479_vm14 = vcmp.eq.f32.partialorder %v478_v32, 8.507059e+37 }
 0x1a4   :  { %v1069_v16 = vpop.xlane.xlu0 %371  ;;  %v407_v18 = vsel %vm404_vm15, %v406_v6, %v402_v12  ;;  %v432_v19 = vsel %vm431_vm2, %v799_v47, %v428_v7  ;;  %v440_v22 = vmul.f32 %v803_v17, %v1060_v55  ;;  %v805_v23 = vpop.eup %804  ;;  %vm445_vm8 = vweird.f32 %v803_v17  ;;  %vm491_vm9 = vmor %vm489_vm4, %vm490_vm6 }
 0x1a5   :  { %806 = vrcp.f32 %v1069_v16  ;;  %v437_v54 = vsel %vm434_vm3, %v436_v13, %v432_v19  ;;  %v486_v21 = vsub.f32 1.0, %v485_v15  ;;  %v500_v26 = vmul.f32 %v1018_v62, %v407_v18  ;;  %vm446_vm12 = vmor %vm444_vm5, %vm445_vm8 }
 0x1a6   :  { %v441_v28 = vsub.f32 1.0, %v440_v22  ;;  %v470_v29 = vmul.f32 %v805_v23, %v1054_v48  ;;  %v502_v33 = vmul.f32 %v1020_v1, %v437_v54  ;;  %vm475_vm11 = vweird.f32 %v805_v23 }
 0x1a7   :  { %v487_v27 = vmul.f32 %v801_v5, %v486_v21  ;;  %762 = vmatmul.msk.f32.vlgmr.msra.gmra.mxu1 %vm306_vm1, %v500_v26  ;;  %700 = vst.msk [vmem:[#allocation9 + $0x8] sm:$0xff] %vm306_vm1, %v500_v26  ;;  %vm476_vm15 = vmor %vm474_vm13, %vm475_vm11  ;;  %v481_v51 = vor.u32 1.1754944e-38, %v480_v39  ;;  %v463_v52 = vand.u32 2147483647, %v1069_v16  ;;  %v465_v53 = vand.u32 2147483648, %v1069_v16 }
 0x1a8   :  { %v442_v34 = vmul.f32 %v803_v17, %v441_v28  ;;  %v471_v35 = vsub.f32 1.0, %v470_v29  ;;  %764 = vmatmul.msk.f32.vlgmr.msra.gmra.mxu3 %vm306_vm1, %v502_v33  ;;  %702 = vst.msk [vmem:[#allocation9 + $0x18] sm:$0xff] %vm306_vm1, %v502_v33  ;;  %vm459_vm3 = vweird.f32 %v1069_v16 }
 0x1a9   :  { %v488_v62 = vadd.f32 %v801_v5, %v487_v27  ;;  %v466_v59 = vor.u32 1.1754944e-38, %v465_v53  ;;  %vm464_vm5 = vcmp.eq.f32.partialorder %v463_v52, 8.507059e+37 }
 0x1aa   :  { %v443_v40 = vadd.f32 %v803_v17, %v442_v34  ;;  %v472_v41 = vmul.f32 %v805_v23, %v471_v35 }
 0x1ab   :  { %v807_v36 = vpop.eup %806  ;;  %v492_v1 = vsel %vm491_vm9, %v801_v5, %v488_v62 }
 0x1ac   :  { %v455_v42 = vmul.f32 %v807_v36, %v1069_v16  ;;  %v497_v43 = vsel %vm1082_vm7, %v496_v37, %v492_v1  ;;  %v447_v46 = vsel %vm446_vm12, %v803_v17, %v443_v40  ;;  %v473_v47 = vadd.f32 %v805_v23, %v472_v41 }
 0x1ad   :  { %v506_v45 = vmul.f32 %v1028_v9, %v497_v43  ;;  %v452_v50 = vsel %vm1093_vm10, %v451_v44, %v447_v46  ;;  %vm460_vm2 = vweird.f32 %v807_v36 }
 0x1ae   :  { %v456_v49 = vsub.f32 1.0, %v455_v42  ;;  %v503_v48 = vmul.f32 %v1030_v10, %v452_v50  ;;  %v477_v55 = vsel %vm476_vm15, %v805_v23, %v473_v47  ;;  %vm461_vm4 = vmor %vm459_vm3, %vm460_vm2 }
 0x1af   :  { %706 = vst.msk [vmem:[#allocation9 + $0x38] sm:$0xff] %vm306_vm1, %v506_v45  ;;  %v482_v9 = vsel %vm479_vm14, %v481_v51, %v477_v55 }
 0x1b0   :  { %v457_v56 = vmul.f32 %v807_v36, %v456_v49  ;;  %703 = vst.msk [vmem:[#allocation9 + $0x20] sm:$0xff] %vm306_vm1, %v503_v48  ;;  %765 = vmatmul.msk.f32.vlgmr.msrb.gmra.mxu0 %vm306_vm1, %v503_v48  ;;  %v505_v58 = vmul.f32 %v1026_v8, %v482_v9  ;;  %768 = vmatmul.msk.f32.vlgmr.msrb.gmra.mxu3 %vm306_vm1, %v506_v45 }
 0x1b2   :  { %v458_v57 = vadd.f32 %v807_v36, %v457_v56  ;;  %767 = vmatmul.msk.f32.vlgmr.msrb.gmra.mxu2 %vm306_vm1, %v505_v58  ;;  %705 = vst.msk [vmem:[#allocation9 + $0x30] sm:$0xff] %vm306_vm1, %v505_v58 }
 0x1b4   :  { %v462_v60 = vsel %vm461_vm4, %v807_v36, %v458_v57 }
 0x1b5   :  { %v467_v10 = vsel %vm464_vm5, %v466_v59, %v462_v60 }
 0x1b6   :  { %v504_v61 = vmul.f32 %v1038_v14, %v467_v10 }
 0x1b8   :  { %704 = vst.msk [vmem:[#allocation9 + $0x28] sm:$0xff] %vm306_vm1, %v504_v61  ;;  %766 = vmatmul.msk.f32.vlgmr.msrb.gmra.mxu1 %vm306_vm1, %v504_v61 }
 0x1b9   :  { %732 = dma.vmem_to_hbm [thread:$0]  %s725_s30, 1024, %s727_s7, [#allocation10], %s937_s23, %s937_s23, %s938_s24  }
 0x216   :  { %v527_v8 = vpop.f32.mrf.mxu0 }
 0x217   :  { %691 = vst.msk [vmem:[#allocation8] sm:$0xff] %vm97_vm0, %v527_v8 }
 0x222   :  { %v573_v63 = vpop.f32.mrf.mxu2 }
 0x223   :  { %693 = vst.msk [vmem:[#allocation8 + $0x10] sm:$0xff] %vm97_vm0, %v573_v63 }
 0x224   :  { %v550_v14 = vpop.f32.mrf.mxu1 }
 0x225   :  { %692 = vst.msk [vmem:[#allocation8 + $0x8] sm:$0xff] %vm97_vm0, %v550_v14 }
 0x22b   :  { %v596_v0 = vpop.f32.mrf.mxu3 }
 0x22c   :  { %694 = vst.msk [vmem:[#allocation8 + $0x18] sm:$0xff] %vm97_vm0, %v596_v0 }
 0x22d   :  { %v619_v2 = vpop.f32.mrf.mxu0 }
 0x22e   :  { %695 = vst.msk [vmem:[#allocation8 + $0x20] sm:$0xff] %vm97_vm0, %v619_v2 }
 0x233   :  { %v688_v4 = vpop.f32.mrf.mxu3 }
 0x234   :  { %698 = vst.msk [vmem:[#allocation8 + $0x38] sm:$0xff] %vm97_vm0, %v688_v4 }
 0x235   :  { %v642_v3 = vpop.f32.mrf.mxu1  ;;  %v665_v5 = vpop.f32.mrf.mxu2 }
 0x236   :  { %696 = vst.msk [vmem:[#allocation8 + $0x28] sm:$0xff] %vm97_vm0, %v642_v3 }
 0x237   :  { %697 = vst.msk [vmem:[#allocation8 + $0x30] sm:$0xff] %vm97_vm0, %v665_v5 }
 0x238   :  { %719 = dma.vmem_to_hbm [thread:$0]  %s712_s8, 1024, %s714_s11, [#allocation4], %s937_s23, %s937_s23, %s938_s24  }
 0x239   :  { %932 = dma.done.wait [#allocation4], 1024  }
 0x23a   :  { %933 = vsyncadd [#allocation4], 4294966272 }
 0x23b   :  { %934 = dma.done.wait [#allocation10], 1024  }
 0x23c   :  { %935 = vsyncadd [#allocation10], 4294966272 }
 0x23d   :  { %741 = vsyncpa [#allocation3], 1 }
 0x23e   :  { %742 = vsyncpa [#allocation6], 1 }
 0x23f   :  { %743 = vsyncpa [#allocation4], 1 }
 0x240   :  { %744 = vsyncpa [#allocation10], 1 }

</bundles_post_ra>
